<compile_context>
chip_gen: v5e
topology: v5e:2x2
jax: 0.10.0
libtpu: 0.0.40
codegen_flags: <defaults>
</compile_context>

<pallas_src>
import functools

import numpy as np
import jax
import jax.numpy as jnp
from jax import lax
from jax.experimental import pallas as pl
from jax.experimental.pallas import tpu as pltpu


def _round_up(x: int, m: int) -> int:
    return ((x + m - 1) // m) * m


def _tpu_generation():
    """Best-effort chip-generation string ('v5', 'v6', 'v7') or None."""
    try:
        kind = jax.devices()[0].device_kind.lower()
    except Exception:  # no TPU visible at trace time; use generic defaults
        return None
    for g in ("v7", "v6", "v5", "v4"):
        if g in kind:
            return g
    return None


def _apply_act(m, act):
    if act == "tanh":
        return jnp.tanh(m)
    if act == "elu":
        # F.elu with alpha=1; written with exp/where for robust TPU lowering.
        return jnp.where(m > 0, m, jnp.exp(jnp.minimum(m, 0.0)) - 1.0)
    return m  # 'id'


def _edge_type_maps_kernel(et_ref, table_ref, o_ref, *, act, num_edge_types,
                           chunk, num_chunks):
    """One edge tile: one_hot(edge_type) -> table matmul -> activation.

    et_ref:    (1, TILE_E) int32   edge types, lane-dense along the edge axis
    table_ref: (P, T)      float32 MLP evaluated on the identity (bias incl.)
    o_ref:     (P, TILE_E)         lane-dense output (edges on the 128 lanes)

    The tile is processed in `num_chunks` lane sub-blocks of `chunk` lanes so
    the iota/one-hot intermediates stay small regardless of TILE_E.
    """
    table = table_ref[...]                                       # (P, T) tiny

    def body(c, carry):
        off = pl.multiple_of(c * chunk, chunk)
        et = et_ref[:, pl.ds(off, chunk)]                        # (1, chunk)
        t_iota = lax.broadcasted_iota(jnp.int32, (num_edge_types, chunk), 0)
        onehot_t = (t_iota == et).astype(jnp.float32)            # (T, chunk)
        # Single MXU matmul per chunk: (P, T) @ (T, chunk) -> (P, chunk).
        maps_t = jnp.dot(table, onehot_t, preferred_element_type=jnp.float32)
        maps_t = _apply_act(maps_t, act)
        o_ref[:, pl.ds(off, chunk)] = maps_t.astype(o_ref.dtype)
        return carry

    lax.fori_loop(0, num_chunks, body, 0, unroll=(num_chunks <= 16))


def edge_type_sheaf_maps_lane_major(edge_types, table_t, *, act,
                                    out_dtype=jnp.float32,
                                    min_pallas_edges=8192,
                                    force_pallas=False):
    """Returns act(one_hot(edge_types) @ table_t.T), lane-major as (P, E)."""
    (E,) = edge_types.shape
    P, T = table_t.shape

    if E < min_pallas_edges and not force_pallas:
        # Tiny-E fallback: a fused XLA gather beats the pallas fixed cost.
        return _apply_act(jnp.take(table_t, edge_types.astype(jnp.int32),
                                   axis=1), act).astype(out_dtype)

    gen = _tpu_generation()

    # Tile sizing: big, lane-aligned edge tiles (mem/step-overhead bound op).
    e128 = _round_up(max(E, 1), 128)
    if e128 <= 2048:
        tile_e = e128
    else:
        tile_e = min(32768, _round_up(e128, 2048))
    e_pad = _round_up(e128, tile_e)
    # v7x only: make sure there are >= 2 large tiles so the parallel grid axis
    # can be sharded across both TensorCores.  On v5e/v6e the grid is a serial
    # loop, so extra tiles would be pure per-step overhead.
    if gen == "v7" and (e_pad // tile_e) < 2 and e128 >= 4096:
        tile_e = _round_up(pl.cdiv(e128, 2), 2048)
        e_pad = _round_up(e128, tile_e)
    chunk = min(tile_e, 2048)                 # tile_e % chunk == 0 by design
    num_chunks = tile_e // chunk

    et = edge_types.astype(jnp.int32).reshape(1, E)
    et_pad = jnp.pad(et, ((0, 0), (0, e_pad - E)))
    # TODO(synk): for very large E, scalar-prefetch E and mask the tail lanes
    # in-kernel instead of padding host-side (saves one pass over edge_types).

    kern = functools.partial(_edge_type_maps_kernel, act=act,
                             num_edge_types=T, chunk=chunk,
                             num_chunks=num_chunks)
    out_bytes = jnp.dtype(out_dtype).itemsize
    cost = pl.CostEstimate(
        flops=2 * e_pad * P * T,
        transcendentals=(e_pad * P) if act in ("tanh", "elu") else 0,
        bytes_accessed=4 * e_pad + 4 * P * T + out_bytes * P * e_pad,
    )

    maps_t = pl.pallas_call(
        kern,
        out_shape=jax.ShapeDtypeStruct((P, e_pad), out_dtype),
        grid_spec=pltpu.PrefetchScalarGridSpec(
            num_scalar_prefetch=0,
            grid=(e_pad // tile_e,),
            in_specs=[
                pl.BlockSpec((1, tile_e), lambda i: (0, i)),   # edge-type tile
                pl.BlockSpec((P, T), lambda i: (0, 0)),        # resident table
            ],
            out_specs=pl.BlockSpec((P, tile_e), lambda i: (0, i)),
        ),
        compiler_params=pltpu.CompilerParams(
            dimension_semantics=("parallel",)),
        cost_estimate=cost,
    )(et_pad, table_t)
    return maps_t[:, :E]


def edge_type_sheaf_maps(edge_types, table_t, *, act, out_dtype=jnp.float32,
                         min_pallas_edges=8192, force_pallas=False):
    """Edge-major (E, P) result (PyTorch layout); one extra transpose pass."""
    return edge_type_sheaf_maps_lane_major(
        edge_types, table_t, act=act, out_dtype=out_dtype,
        min_pallas_edges=min_pallas_edges, force_pallas=force_pallas).T


class EdgeTypeSheafLearner:
    """JAX/Pallas port of EdgeTypeSheafLearner (forward only)."""

    def __init__(self, in_channels, out_shape, sheaf_act="tanh",
                 num_node_types=4, num_edge_types=12, num_layers=1,
                 hidden_channels=64, *, key=None, min_pallas_edges=8192,
                 out_dtype=jnp.float32):
        assert len(out_shape) in (1, 2)
        if sheaf_act not in ("id", "tanh", "elu"):
            raise ValueError(f"Unsupported act {sheaf_act}")
        self.L = None
        self.out_shape = tuple(int(s) for s in out_shape)
        self.sheaf_act = sheaf_act
        self.num_node_types = num_node_types
        self.num_edge_types = num_edge_types
        self.min_pallas_edges = min_pallas_edges
        self.out_dtype = out_dtype
        out_channels = int(np.prod(self.out_shape))

        # MLP(in=num_edge_types, hidden=hidden_channels, out=prod(out_shape),
        # num_layers, normalisation='None'): Linear stack with ReLU between
        # layers, no activation/norm after the last layer.
        if num_layers == 1:
            dims = [num_edge_types, out_channels]
        else:
            dims = ([num_edge_types] + [hidden_channels] * (num_layers - 1)
                    + [out_channels])
        if key is None:
            key = jax.random.PRNGKey(0)
        self.layers = []
        for d_in, d_out in zip(dims[:-1], dims[1:]):
            key, kw, kb = jax.random.split(key, 3)
            bound = 1.0 / float(np.sqrt(d_in))
            w = jax.random.uniform(kw, (d_out, d_in), jnp.float32, -bound, bound)
            b = jax.random.uniform(kb, (d_out,), jnp.float32, -bound, bound)
            self.layers.append((w, b))

    def set_L(self, weights):
        self.L = jax.lax.stop_gradient(weights)

    def _mlp(self, z):
        """Row-wise MLP in plain JAX (used for the constant-size table)."""
        n = len(self.layers)
        for i, (w, b) in enumerate(self.layers):
            z = z @ w.T + b
            if i < n - 1:
                z = jax.nn.relu(z)
        return z

    def _table_t(self):
        # MLP(one_hot(et)) == MLP(I)[et]; evaluate the MLP on the identity.
        table = self._mlp(jnp.eye(self.num_edge_types, dtype=jnp.float32))
        return table.T                                   # (P, T)

    def __call__(self, x, edge_index, edge_types=None, node_types=None,
                 *, lane_major=False, force_pallas=False):
        del x, edge_index, node_types   # forward depends only on edge_types
        assert edge_types is not None
        maps_pe = edge_type_sheaf_maps_lane_major(
            edge_types, self._table_t(), act=self.sheaf_act,
            out_dtype=self.out_dtype, min_pallas_edges=self.min_pallas_edges,
            force_pallas=force_pallas)                   # (P, E), lane-dense
        if lane_major:
            # Transpose-free layout for downstream consumers: (d, d, E) /
            # (d_out, E).  maps_pe.reshape is free (no data movement).
            return maps_pe.reshape(*self.out_shape, -1)
        # PyTorch-compatible edge-major layout (adds one transpose pass).
        maps = maps_pe.T                                 # (E, P)
        if len(self.out_shape) == 2:
            return maps.reshape(-1, self.out_shape[0], self.out_shape[1])
        return maps.reshape(-1, self.out_shape[0])


if __name__ == "__main__":
    key = jax.random.PRNGKey(0)
    k_x, k_src, k_dst, k_et, k_param = jax.random.split(key, 5)

    num_nodes = 16
    in_channels = 32
    num_edges = 200           # deliberately NOT a multiple of 128 (pad path)
    num_edge_types = 12
    out_shape = (3, 3)        # sheaf restriction maps d x d, d = 3

    x = jax.random.normal(k_x, (num_nodes, in_channels), dtype=jnp.float32)
    src = jax.random.randint(k_src, (num_edges,), 0, num_nodes, dtype=jnp.int32)
    dst = jax.random.randint(k_dst, (num_edges,), 0, num_nodes, dtype=jnp.int32)
    edge_index = jnp.stack([src, dst], axis=0)                  # (2, E)
    edge_types = jax.random.randint(k_et, (num_edges,), 0, num_edge_types,
                                    dtype=jnp.int32)            # (E,)

    # min_pallas_edges=0 so the Pallas kernel (not the small-E XLA fallback)
    # is exercised at this test size.
    learner = EdgeTypeSheafLearner(in_channels, out_shape, sheaf_act="tanh",
                                   num_edge_types=num_edge_types,
                                   key=k_param, min_pallas_edges=0)
    out = learner(x, edge_index, edge_types)
    out = jax.block_until_ready(out)
    assert out.shape == (num_edges, out_shape[0], out_shape[1])

    # Pure-JAX reference: exactly the PyTorch forward.
    one_hot = jax.nn.one_hot(edge_types, num_edge_types, dtype=jnp.float32)
    ref = jnp.tanh(learner._mlp(one_hot)).reshape(-1, out_shape[0], out_shape[1])
    np.testing.assert_allclose(np.asarray(out), np.asarray(ref),
                               rtol=1e-5, atol=1e-5)

    # Transpose-free lane-major layout from the same kernel output.
    out_lm = jax.block_until_ready(
        learner(x, edge_index, edge_types, lane_major=True))
    assert out_lm.shape == (out_shape[0], out_shape[1], num_edges)
    np.testing.assert_allclose(np.transpose(np.asarray(out_lm), (2, 0, 1)),
                               np.asarray(ref), rtol=1e-5, atol=1e-5)

    # Small-E plain-XLA fallback path (default threshold) matches too.
    learner_fb = EdgeTypeSheafLearner(in_channels, out_shape, sheaf_act="tanh",
                                      num_edge_types=num_edge_types,
                                      key=k_param)
    out_fb = jax.block_until_ready(learner_fb(x, edge_index, edge_types))
    np.testing.assert_allclose(np.asarray(out_fb), np.asarray(ref),
                               rtol=1e-5, atol=1e-5)

    print("KERNEL_OK")
</pallas_src>

<mosaic_0001>
module attributes {stable_mosaic.version = 11 : i64} {
  func.func @_edge_type_maps_kernel(%arg0: i32, %arg1: memref<1x256xi32, #tpu.memory_space<vmem>>, %arg2: memref<9x12xf32, #tpu.memory_space<vmem>>, %arg3: memref<9x256xf32, #tpu.memory_space<vmem>>) attributes {dimension_semantics = [#tpu.dimension_semantics<parallel>], iteration_bounds = array<i64: 1>, scalar_prefetch = 0 : i64, scratch_operands = 0 : i64, tpu.core_type = #tpu.core_type<tc>, window_params = [{transform_indices = @transform_0, window_bounds = array<i64: 1, 256>}, {pipeline_mode = #tpu.pipeline_mode<synchronous>, transform_indices = @transform_1, window_bounds = array<i64: 9, 12>}, {transform_indices = @transform_2, window_bounds = array<i64: 9, 256>}]} {
    %c0 = arith.constant 0 : index
    %c0_0 = arith.constant 0 : index
    %0 = vector.load %arg2[%c0, %c0_0] : memref<9x12xf32, #tpu.memory_space<vmem>>, vector<9x12xf32>
    %c0_i32 = arith.constant 0 : i32
    %c256_i32 = arith.constant 256 : i32
    %1 = arith.muli %c0_i32, %c256_i32 : i32
    %2 = tpu.assume_multiple %1, 256 : i32
    %c0_1 = arith.constant 0 : index
    %3 = arith.index_cast %2 : i32 to index
    %4 = vector.load %arg1[%c0_1, %3] : memref<1x256xi32, #tpu.memory_space<vmem>>, vector<1x256xi32>
    %5 = tpu.iota {dimensions = array<i32: 0>} : vector<12x256xi32>
    %6 = vector.broadcast %4 : vector<1x256xi32> to vector<12x256xi32>
    %7 = arith.cmpi eq, %5, %6 : vector<12x256xi32>
    %8 = arith.extui %7 : vector<12x256xi1> to vector<12x256xi32>
    %9 = arith.sitofp %8 : vector<12x256xi32> to vector<12x256xf32>
    %cst = arith.constant dense<0.000000e+00> : vector<9x256xf32>
    %10 = tpu.matmul %0, %9, %cst {dimension_numbers = #tpu.dot_dimension_numbers<[1], [0], [0], [1], [0, 0, 1, 1], [], []>} : vector<9x12xf32>, vector<12x256xf32>, vector<9x256xf32> -> vector<9x256xf32>
    %11 = math.tanh %10 : vector<9x256xf32>
    %c0_2 = arith.constant 0 : index
    %12 = arith.index_cast %2 : i32 to index
    %13 = vector.load %arg3[%c0_2, %12] : memref<9x256xf32, #tpu.memory_space<vmem>>, vector<9x256xf32>
    tpu.vector_store %arg3[%c0_2, %12], %11 {strides = array<i32>} : memref<9x256xf32, #tpu.memory_space<vmem>>, vector<9x256xf32>,
    %c1_i32 = arith.constant 1 : i32
    return
  }
  func.func @transform_0(%arg0: i32) -> (i32, i32) {
    %c0_i32 = arith.constant 0 : i32
    %c0_i32_0 = arith.constant 0 : i32
    return %c0_i32, %arg0 : i32, i32
  }
  func.func @transform_1(%arg0: i32) -> (i32, i32) {
    %c0_i32 = arith.constant 0 : i32
    %c0_i32_0 = arith.constant 0 : i32
    %c0_i32_1 = arith.constant 0 : i32
    return %c0_i32, %c0_i32_0 : i32, i32
  }
  func.func @transform_2(%arg0: i32) -> (i32, i32) {
    %c0_i32 = arith.constant 0 : i32
    %c0_i32_0 = arith.constant 0 : i32
    return %c0_i32, %arg0 : i32, i32
  }
}

</mosaic_0001>

<bundles_post_ra>
// kernel: tpu_custom_call.1
= control target key start
LH: loop header
LB: loop body
LE: loop exit
PB: predicated region body
PF: predicated region fallthrough
CT: control target
= control target key end

     0   :  { %7 = vsyncpa [#allocation3], 0  ;;  %s294_s0 = inlined_call_operand.hbm [shape: s32[1,256], index: 0, kind: input, shape index: {}]   ;;  %s295_s1 = inlined_call_operand.hbm [shape: f32[9,12], index: 1, kind: input, shape index: {}]   ;;  %s296_s2 = inlined_call_operand.hbm [shape: f32[9,256], index: 2, kind: output, shape index: {}]  }
   0x1   :  { %8 = vsyncpa [#allocation6], 0 }
   0x2   :  { %9 = vsyncpa [#allocation4], 0  ;;  %s15_s11 = sshll.u32 %s294_s0, 4  ;;  %s261_s12 = smov [#allocation2]   ;;  %s16_s11 = int_to_ptr.hbm [resolvable:$true] %s15_s11 }
   0x3   :  { %s17_s13 = sshll.u32 %s261_s12, 4  ;;  %s25_s16 = sshll.u32 %s295_s1, 4  ;;  %s18_s13 = int_to_ptr.vmem [resolvable:$true] %s17_s13  ;;  %s26_s16 = int_to_ptr.hbm [resolvable:$true] %s25_s16 }
   0x4   :  { %20 = dma.hbm_to_vmem [thread:$0]  %s16_s11, 32, %s18_s13, [#allocation3]  }
   0x5   :  { %s262_s17 = smov [#allocation5]   ;;  %s263_s19 = smov 128  }
   0x6   :  { %s27_s18 = sshll.u32 %s262_s17, 4  ;;  %s264_s20 = smov 8   ;;  %s28_s18 = int_to_ptr.vmem [resolvable:$true] %s27_s18 }
   0x7   :  { %33 = dma.hbm_to_vmem [thread:$0]  %s26_s16, 256, %s28_s18, [#allocation6], %s263_s19, %s263_s19, %s264_s20  }
   0x8   :  { %255 = dma.done.wait [#allocation3], 32  }
   0x9   :  { %256 = vsyncadd [#allocation3], 4294967264 }
   0xa   :  { %257 = dma.done.wait [#allocation6], 256  }
   0xb   :  { %258 = vsyncadd [#allocation6], 4294967040  ;;  %v45_v0 = vlaneseq  ;;  %v44_v3 = vld [vmem:[#allocation2] sm:$0x3]  ;;  %vm69_vm0 = vcmask 1043456   ;;  %v265_v6 = vmov 0.0  }
   0xc   :  { %v48_v4 = vperm.slane %v44_v3, 0  ;;  %v49_v5 = vperm.slane %v44_v3, 1  ;;  %v43_v9 = vld [vmem:[#allocation5 + $0x8] sm:$0x1]  ;;  %vm62_vm5 = vcmask 97280   ;;  %v266_v10 = vmov 1.0  }
   0xd   :  { %v46_v1 = vshrl.u32 %v45_v0, 7  ;;  %v42_v11 = vld [vmem:[#allocation5] sm:$0xff]  ;;  %s267_s0 = smov [#allocation7]   ;;  %s136_s23 = sshll.u32 %s296_s2, 4  ;;  %s137_s23 = int_to_ptr.hbm [resolvable:$true] %s136_s23 }
   0xe   :  { %s134_s1 = sshll.u32 %s267_s0, 4  ;;  %s268_s24 = smov 256   ;;  %s135_s1 = int_to_ptr.vmem [resolvable:$true] %s134_s1 }
   0xf   :  { %v47_v2 = vadd.s32 8, %v46_v1  ;;  %vm50_vm3 = vcmp.eq.s32.totalorder %v46_v1, %v48_v4  ;;  %vm51_vm4 = vcmp.eq.s32.totalorder %v46_v1, %v49_v5  ;;  %s269_s25 = smov 16  }
  0x11   :  { %vm52_vm1 = vcmp.eq.s32.totalorder %v47_v2, %v48_v4  ;;  %vm53_vm2 = vcmp.eq.s32.totalorder %v47_v2, %v49_v5 }
  0x12   :  { %v152_v7 = vsel %vm52_vm1, 1.0, %v265_v6  ;;  %v153_v8 = vsel %vm53_vm2, 1.0, %v265_v6 }
  0x13   :  { %162 = vmatpush.msk.msra.mxu2 %vm69_vm0, %v152_v7  ;;  %164 = vmatpush.msk.msra.mxu3 %vm69_vm0, %v153_v8 }
  0x14   :  { %154 = vmatpush.msk.msra.mxu0 %vm69_vm0, %v152_v7  ;;  %158 = vmatpush.msk.msra.mxu1 %vm69_vm0, %v153_v8 }
  0x15   :  { %163 = vmatpush.msk.msra.mxu2 %vm50_vm3, %v266_v10  ;;  %165 = vmatpush.msk.msra.mxu3 %vm51_vm4, %v266_v10 }
  0x16   :  { %157 = vmatmul.msk.f32.vlgmr.msra.gmra.mxu2 %vm62_vm5, %v43_v9  ;;  %161 = vmatmul.msk.f32.vlgmr.msra.gmra.mxu3 %vm62_vm5, %v43_v9 }
  0x17   :  { %155 = vmatpush.msk.msra.mxu0 %vm50_vm3, %v266_v10  ;;  %159 = vmatpush.msk.msra.mxu1 %vm51_vm4, %v266_v10 }
  0x18   :  { %156 = vmatmul.msk.f32.vlgmr.msra.gmra.mxu0 %vm62_vm5, %v42_v11  ;;  %160 = vmatmul.msk.f32.vlgmr.msra.gmra.mxu1 %vm62_vm5, %v42_v11 }
  0x95   :  { %v93_v12 = vpop.f32.mrf.mxu0  ;;  %v116_v13 = vpop.f32.mrf.mxu1 }
  0x96   :  { %175 = vtanh.f32 %v93_v12 }
  0x97   :  { %177 = vtanh.f32 %v116_v13 }
  0x99   :  { %v96_v14 = vpop.f32.mrf.mxu2  ;;  %v119_v15 = vpop.f32.mrf.mxu3 }
  0x9a   :  { %179 = vtanh.f32 %v96_v14 }
  0x9b   :  { %181 = vtanh.f32 %v119_v15 }
  0x9c   :  { %v176_v16 = vpop.eup %175 }
  0x9d   :  { %v178_v17 = vpop.eup %177  ;;  %126 = vst [vmem:[#allocation7] sm:$0xff] %v176_v16 }
  0x9e   :  { %127 = vst [vmem:[#allocation7 + $0x8] sm:$0xff] %v178_v17 }
  0xa0   :  { %v180_v18 = vpop.eup %179 }
  0xa1   :  { %v182_v19 = vpop.eup %181  ;;  %128 = vst [vmem:[#allocation7 + $0x10] sm:$0x1] %v180_v18 }
  0xa2   :  { %129 = vst [vmem:[#allocation7 + $0x18] sm:$0x1] %v182_v19 }
  0xa3   :  { %142 = dma.vmem_to_hbm [thread:$0]  %s135_s1, 512, %s137_s23, [#allocation4], %s268_s24, %s268_s24, %s269_s25  }
  0xa4   :  { %259 = dma.done.wait [#allocation4], 512  }
  0xa5   :  { %260 = vsyncadd [#allocation4], 4294966784 }
  0xa6   :  { %147 = vsyncpa [#allocation3], 1 }
  0xa7   :  { %148 = vsyncpa [#allocation6], 1 }
  0xa8   :  { %149 = vsyncpa [#allocation4], 1 }

</bundles_post_ra>
